<compile_context>
chip_gen: v5e
topology: v5e:2x2
jax: 0.10.0
libtpu: 0.0.40
codegen_flags: <defaults>
</compile_context>

<pallas_src>
import functools
import math

import jax
import jax.numpy as jnp
from jax.experimental import pallas as pl
from jax.experimental.pallas import tpu as pltpu

# ----- small config mirroring SupervoiceVariant2 (shrunk so the demo runs fast) -----
N_DIM = 128          # module: 1024
N_VOCAB = 256        # module: 8192
MAX_SEQ_LEN = 64     # module: 8192
N_MELS = 16          # module: config.audio.n_mels
N_HEADS = 8          # module: 16
N_DIM_HEAD = 16      # module: 16
N_INNER = N_HEADS * N_DIM_HEAD   # 128 here (module: 256); lane-dense attention output
N_DIM_FFN = 4 * N_DIM
N_LAYERS = 4         # module: 12
LN_EPS = 1e-5
NEG_INF = -1e30

COMPUTE_DTYPE = jnp.bfloat16


def _round_up(x, m):
    return (x + m - 1) // m * m


# --------------------------- generic fused matmul kernel ---------------------------

def _fused_matmul_kernel(*refs, n_in, use_ln, has_bias, has_res, activation):
    """out = act(sum_i LN?(x_i) @ w_i + bias) + residual   (f32 accumulation)."""
    idx = 0
    x_refs = refs[idx:idx + n_in]; idx += n_in
    w_refs = refs[idx:idx + n_in]; idx += n_in
    if use_ln:
        g_ref, bln_ref = refs[idx], refs[idx + 1]; idx += 2
    if has_bias:
        bias_ref = refs[idx]; idx += 1
    if has_res:
        res_ref = refs[idx]; idx += 1
    o_ref = refs[idx]

    acc = None
    for i in range(n_in):
        x = x_refs[i][...]
        if use_ln and i == 0:
            xf = x.astype(jnp.float32)
            mu = jnp.mean(xf, axis=-1, keepdims=True)
            var = jnp.mean(jnp.square(xf - mu), axis=-1, keepdims=True)
            xf = (xf - mu) * jax.lax.rsqrt(var + LN_EPS)
            x = xf * g_ref[...] + bln_ref[...]
        x = x.astype(w_refs[i].dtype)
        part = jnp.dot(x, w_refs[i][...], preferred_element_type=jnp.float32)
        acc = part if acc is None else acc + part
    if has_bias:
        acc = acc + bias_ref[...].astype(jnp.float32)
    if activation == "gelu":
        # TODO(synk): torch.nn.GELU default is exact erf; tanh approximation used (EUP path).
        acc = jax.nn.gelu(acc, approximate=True)
    if has_res:
        acc = acc + res_ref[...].astype(jnp.float32)
    o_ref[...] = acc.astype(o_ref.dtype)


def fused_matmul(xs, ws, *, ln=None, bias=None, residual=None, activation=None,
                 out_dtype=None, bm=256, bn=512):
    """Fused (LayerNorm +) multi-input matmul (+ bias/activation/residual).

    xs: list of (M, K_i); ws: list of (K_i, N); ln=(gamma, beta) applies to xs[0].
    Tiled over (M, N); K kept whole (fits VMEM at these widths).
    """
    xs = list(xs)
    ws = list(ws)
    n_in = len(xs)
    M = xs[0].shape[0]
    N = ws[0].shape[1]
    out_dtype = out_dtype or xs[0].dtype

    bm_eff = min(bm, _round_up(M, 16))       # >=16-row sublane-aligned M tiles
    Mp = _round_up(M, bm_eff)
    bn_eff = bn if (N > bn and N % bn == 0) else N

    def pad_rows(a):
        return jnp.pad(a, ((0, Mp - M), (0, 0))) if Mp != M else a

    xs = [pad_rows(x) for x in xs]
    if residual is not None:
        residual = pad_rows(residual)

    args, in_specs = [], []
    for x in xs:
        K = x.shape[1]
        args.append(x)
        in_specs.append(pl.BlockSpec((bm_eff, K), lambda i, j: (i, 0)))
    for w in ws:
        K = w.shape[0]
        args.append(w)
        in_specs.append(pl.BlockSpec((K, bn_eff), lambda i, j: (0, j)))
    use_ln = ln is not None
    if use_ln:
        g, b = ln
        K0 = xs[0].shape[1]
        args += [g.reshape(1, K0).astype(jnp.float32),
                 b.reshape(1, K0).astype(jnp.float32)]
        in_specs += [pl.BlockSpec((1, K0), lambda i, j: (0, 0)),
                     pl.BlockSpec((1, K0), lambda i, j: (0, 0))]
    has_bias = bias is not None
    if has_bias:
        args.append(bias.reshape(1, N).astype(jnp.float32))
        in_specs.append(pl.BlockSpec((1, bn_eff), lambda i, j: (0, j)))
    has_res = residual is not None
    if has_res:
        args.append(residual)
        in_specs.append(pl.BlockSpec((bm_eff, bn_eff), lambda i, j: (i, j)))

    out = pl.pallas_call(
        functools.partial(_fused_matmul_kernel, n_in=n_in, use_ln=use_ln,
                          has_bias=has_bias, has_res=has_res, activation=activation),
        out_shape=jax.ShapeDtypeStruct((Mp, N), out_dtype),
        grid=(Mp // bm_eff, N // bn_eff),
        in_specs=in_specs,
        out_specs=pl.BlockSpec((bm_eff, bn_eff), lambda i, j: (i, j)),
        compiler_params=pltpu.CompilerParams(
            dimension_semantics=("parallel", "parallel")),
    )(*args)
    return out[:M] if Mp != M else out


# --------------------------- flash block-diagonal attention ---------------------------

def _flash_attn_kernel(segq_ref, segk_ref, q_ref, k_ref, v_ref, o_ref,
                       m_ref, l_ref, acc_ref, *, n_heads, d_head, scale):
    ki = pl.program_id(1)

    @pl.when(ki == 0)
    def _init():
        m_ref[...] = jnp.full_like(m_ref, NEG_INF)
        l_ref[...] = jnp.zeros_like(l_ref)
        acc_ref[...] = jnp.zeros_like(acc_ref)

    segq = segq_ref[...]                                      # (tq, 1) int32
    segk = segk_ref[...]                                      # (1, tk) int32
    # Segment ids are contiguous per sequence, so this KV tile contributes to this
    # query tile only if the id ranges overlap (block-diagonal sparsity skip).
    nonempty = jnp.logical_and(jnp.max(segq) >= jnp.min(segk),
                               jnp.min(segq) <= jnp.max(segk))

    @pl.when(nonempty)
    def _update():
        # block-diagonal mask (~ fmha.BlockDiagonalMask) from segment ids
        mask = segq == segk                                   # (tq, tk)

        qb = q_ref[...] * scale                               # (tq, inner) bf16 (exact: 2^-k)
        kb = k_ref[...]                                       # (tk, inner) bf16
        vb = v_ref[...]                                       # (tk, inner) bf16

        for h in range(n_heads):                              # static unroll over heads
            lo = h * d_head
            hi = lo + d_head
            q = qb[:, lo:hi]
            k = kb[:, lo:hi]
            v = vb[:, lo:hi]
            s = jax.lax.dot_general(q, k, (((1,), (1,)), ((), ())),
                                    preferred_element_type=jnp.float32)
            s = jnp.where(mask, s, NEG_INF)
            m_prev = m_ref[h]                                 # (tq, 1)
            m_new = jnp.maximum(m_prev, jnp.max(s, axis=-1, keepdims=True))
            alpha = jnp.exp(m_prev - m_new)
            p = jnp.exp(s - m_new)
            p = jnp.where(mask, p, 0.0)                       # guard fully-masked rows
            l_ref[h] = alpha * l_ref[h] + jnp.sum(p, axis=-1, keepdims=True)
            acc_ref[h] = alpha * acc_ref[h] + jnp.dot(
                p.astype(v.dtype), v, preferred_element_type=jnp.float32)
            m_ref[h] = m_new

    @pl.when(ki == pl.num_programs(1) - 1)
    def _finalize():
        outs = []
        for h in range(n_heads):
            inv_l = pl.reciprocal(l_ref[h], approx=True)      # EUP, effectively free
            outs.append(acc_ref[h] * inv_l)
        # lane-dense (tq, n_heads * d_head) output -> unmasked stores
        o_ref[...] = jnp.concatenate(outs, axis=-1).astype(o_ref.dtype)


def pallas_flash_attention(qkv, seg, *, n_heads, d_head):
    """qkv: (T, 3*inner) packed q|k|v along features; seg: (T,) int32 segment ids.

    Returns (T, inner) with heads side-by-side in the lane dim (no JAX transposes).
    """
    T = qkv.shape[0]
    inner = n_heads * d_head
    assert qkv.shape[1] == 3 * inner

    tq = 128 if T >= 128 else _round_up(T, 16)
    Tp = _round_up(T, tq)
    if Tp != T:
        # padded rows get unique segment ids -> attend only to themselves (no NaNs)
        qkv = jnp.pad(qkv, ((0, Tp - T), (0, 0)))
        seg = jnp.concatenate(
            [seg, 1_000_000 + jnp.arange(Tp - T, dtype=jnp.int32)])
    tk = tq

    segq = seg.reshape(Tp, 1).astype(jnp.int32)
    segk = seg.reshape(1, Tp).astype(jnp.int32)

    out = pl.pallas_call(
        functools.partial(_flash_attn_kernel, n_heads=n_heads, d_head=d_head,
                          scale=1.0 / math.sqrt(d_head)),
        out_shape=jax.ShapeDtypeStruct((Tp, inner), qkv.dtype),
        grid=(Tp // tq, Tp // tk),
        in_specs=[
            pl.BlockSpec((tq, 1), lambda qi, ki: (qi, 0)),        # seg (q rows)
            pl.BlockSpec((1, tk), lambda qi, ki: (0, ki)),        # seg (k cols)
            pl.BlockSpec((tq, inner), lambda qi, ki: (qi, 0)),    # q slab of packed qkv
            pl.BlockSpec((tk, inner), lambda qi, ki: (ki, 1)),    # k slab of packed qkv
            pl.BlockSpec((tk, inner), lambda qi, ki: (ki, 2)),    # v slab of packed qkv
        ],
        out_specs=pl.BlockSpec((tq, inner), lambda qi, ki: (qi, 0)),
        scratch_shapes=[
            pltpu.VMEM((n_heads, tq, 1), jnp.float32),            # running max m
            pltpu.VMEM((n_heads, tq, 1), jnp.float32),            # running sum l
            pltpu.VMEM((n_heads, tq, d_head), jnp.float32),       # output accumulator
        ],
        compiler_params=pltpu.CompilerParams(
            dimension_semantics=("parallel", "arbitrary")),
    )(segq, segk, qkv, qkv, qkv)
    return out[:T] if Tp != T else out


# --------------------------- parameters ---------------------------

def init_params(key):
    ks = jax.random.split(key, 12)
    std = 0.02
    lim = 1.0 / math.sqrt(N_DIM)

    def bf(a):
        return a.astype(jnp.bfloat16)

    p = {
        "pos_emb_text":  bf(std * jax.random.normal(ks[0], (MAX_SEQ_LEN, N_DIM), jnp.float32)),
        "pos_emb_audio": bf(std * jax.random.normal(ks[1], (MAX_SEQ_LEN, N_DIM), jnp.float32)),
        "text_emb":      bf(std * jax.random.normal(ks[2], (N_VOCAB, N_DIM), jnp.float32)),
        "audio_emb_w":   bf(std * jax.random.normal(ks[3], (N_MELS, N_DIM), jnp.float32)),
        "noise_emb_w":   bf(std * jax.random.normal(ks[4], (N_MELS, N_DIM), jnp.float32)),
        "time_emb_w":    jax.random.normal(ks[6], (N_DIM // 2,), jnp.float32),
    }
    # input projection split into three (D, D) halves -> no (T, 3D) concat in HBM
    lim3 = 1.0 / math.sqrt(3 * N_DIM)
    w_in = jax.random.uniform(ks[5], (3 * N_DIM, N_DIM), jnp.float32, -lim3, lim3)
    p["input_proj_w0"] = bf(w_in[:N_DIM])
    p["input_proj_w1"] = bf(w_in[N_DIM:2 * N_DIM])
    p["input_proj_w2"] = bf(w_in[2 * N_DIM:])

    # prediction head padded to 128 lanes (lane-dense stores); sliced back in JAX
    n_pred_pad = _round_up(N_MELS, 128)
    pw = jax.random.uniform(ks[7], (N_DIM, N_MELS), jnp.float32, -lim, lim)
    pb = jax.random.uniform(ks[8], (N_MELS,), jnp.float32, -lim, lim)
    p["pred_w"] = bf(jnp.pad(pw, ((0, 0), (0, n_pred_pad - N_MELS))))
    p["pred_b"] = jnp.pad(pb, (0, n_pred_pad - N_MELS))

    layers = []
    lkeys = jax.random.split(ks[9], N_LAYERS)
    for i in range(N_LAYERS):
        kk = jax.random.split(lkeys[i], 4)
        layers.append(dict(
            attn_ln_g=jnp.ones((N_DIM,), jnp.float32),
            attn_ln_b=jnp.zeros((N_DIM,), jnp.float32),
            attn_qkv_w=bf(jax.random.uniform(kk[0], (N_DIM, 3 * N_INNER), jnp.float32,
                                             -lim, lim)),
            attn_out_w=bf(jax.random.uniform(kk[1], (N_INNER, N_DIM), jnp.float32,
                                             -1.0 / math.sqrt(N_INNER),
                                             1.0 / math.sqrt(N_INNER))),
            mlp_ln_g=jnp.ones((N_DIM,), jnp.float32),
            mlp_ln_b=jnp.zeros((N_DIM,), jnp.float32),
            mlp_in_w=bf(jax.random.uniform(kk[2], (N_DIM, N_DIM_FFN), jnp.float32,
                                           -lim, lim)),
            mlp_in_b=jnp.zeros((N_DIM_FFN,), jnp.float32),
            mlp_out_w=bf(jax.random.uniform(kk[3], (N_DIM_FFN, N_DIM), jnp.float32,
                                            -1.0 / math.sqrt(N_DIM_FFN),
                                            1.0 / math.sqrt(N_DIM_FFN))),
            mlp_out_b=jnp.zeros((N_DIM,), jnp.float32),
        ))
    p["layers"] = layers

    # skip combiner weights split into two (D, D) halves -> no (T, 2D) concat in HBM
    n_skip = N_LAYERS - N_LAYERS // 2
    skeys = jax.random.split(ks[10], n_skip)
    lim2 = 1.0 / math.sqrt(2 * N_DIM)
    combs = []
    for i in range(n_skip):
        w = jax.random.uniform(skeys[i], (2 * N_DIM, N_DIM), jnp.float32, -lim2, lim2)
        combs.append(dict(w_x=bf(w[:N_DIM]), w_skip=bf(w[N_DIM:]),
                          b=jnp.zeros((N_DIM,), jnp.float32)))
    p["skip_combiners"] = combs

    p["out_ln_g"] = jnp.ones((N_DIM,), jnp.float32)
    p["out_ln_b"] = jnp.zeros((N_DIM,), jnp.float32)
    return p


# --------------------------- model ---------------------------

def attention_block(layer, x, seg):
    # attention sub-block: fused(LN + QKV) -> flash attention -> fused(out-proj + residual)
    qkv = fused_matmul([x], [layer["attn_qkv_w"]],
                       ln=(layer["attn_ln_g"], layer["attn_ln_b"]))
    o = pallas_flash_attention(qkv, seg, n_heads=N_HEADS, d_head=N_DIM_HEAD)
    x = fused_matmul([o], [layer["attn_out_w"]], residual=x)

    # FFN sub-block: fused(LN + FFN-in + GELU) -> fused(FFN-out + residual)
    # TODO(synk): ffn_dropout=0.1 treated as eval-mode identity.
    h = fused_matmul([x], [layer["mlp_in_w"]],
                     ln=(layer["mlp_ln_g"], layer["mlp_ln_b"]),
                     bias=layer["mlp_in_b"], activation="gelu")
    x = fused_matmul([h], [layer["mlp_out_w"]], bias=layer["mlp_out_b"], residual=x)
    return x


def transformer(params, x, seg):
    connections = []
    half = N_LAYERS // 2
    skip_idx = 0
    for i in range(N_LAYERS):
        if i < half:
            connections.append(x)
        else:
            skip = connections.pop()
            comb = params["skip_combiners"][skip_idx]
            skip_idx += 1
            # concat([x, skip]) @ W  ==  x @ W_top + skip @ W_bot  (fused, no HBM concat)
            x = fused_matmul([x, skip], [comb["w_x"], comb["w_skip"]], bias=comb["b"])
        x = attention_block(params["layers"][i], x, seg)
    return x   # final LayerNorm is fused into the prediction head


@jax.jit
def _embed_and_project(params, tokens, pos, audio, noisy):
    # embeddings (gathers in JAX; matmuls in Pallas with fused pos-emb residual)
    emb_text = params["text_emb"][tokens] + params["pos_emb_text"][pos]
    pos_audio = params["pos_emb_audio"][pos]
    emb_audio = fused_matmul([audio], [params["audio_emb_w"]], residual=pos_audio)
    emb_noisy = fused_matmul([noisy], [params["noise_emb_w"]], residual=pos_audio)
    # input projection: concat([t, a, n]) @ W == t@W0 + a@W1 + n@W2 (fused, no concat)
    return fused_matmul([emb_text, emb_audio, emb_noisy],
                        [params["input_proj_w0"], params["input_proj_w1"],
                         params["input_proj_w2"]])


@jax.jit
def _transformer_and_head(params, x, seg):
    # transformer (block-diagonal attention ~ fmha.BlockDiagonalMask)
    x = transformer(params, x, seg)
    # fused final LayerNorm + prediction head (128-lane padded output, sliced back)
    y = fused_matmul([x], [params["pred_w"]],
                     ln=(params["out_ln_g"], params["out_ln_b"]),
                     bias=params["pred_b"], out_dtype=jnp.float32)
    return y[:, :N_MELS]


def forward(params, condition_text, condition_audio, noisy_audio, times):
    B = len(condition_text)
    durations = [a.shape[0] for a in condition_audio]

    # ---- build flat per-row inputs (glue) ----
    txt, pos = [], []
    for i in range(B):
        d = durations[i]
        t = condition_text[i]
        txt.append(jnp.pad(t, (0, d - t.shape[0])))      # pad text with token 0
        pos.append(jnp.arange(d, dtype=jnp.int32))
    tokens = jnp.concatenate(txt)                        # (T,)
    pos = jnp.concatenate(pos)                           # (T,)
    audio = jnp.concatenate(condition_audio, axis=0).astype(COMPUTE_DTYPE)   # (T, n_mels)
    noisy = jnp.concatenate(noisy_audio, axis=0).astype(COMPUTE_DTYPE)       # (T, n_mels)

    inputs = _embed_and_project(params, tokens, pos, audio, noisy)

    # ---- LearnedSinusoidalPosEmb time embedding ----
    # TODO(synk): exact LearnedSinusoidalPosEmb internals not provided; standard learned
    # sin/cos frequency embedding of width n_dim used.
    t = jnp.asarray(times, dtype=jnp.float32).reshape(B, 1)
    freqs = t * params["time_emb_w"].reshape(1, -1) * (2.0 * math.pi)
    time_emb = jnp.concatenate([jnp.sin(freqs), jnp.cos(freqs)], axis=-1).astype(COMPUTE_DTYPE)

    # ---- append one time row after each sequence; build segment ids ----
    rows, seg = [], []
    offset = 0
    for i in range(B):
        d = durations[i]
        rows.append(inputs[offset:offset + d])
        rows.append(time_emb[i:i + 1])
        seg.append(jnp.full((d + 1,), i, dtype=jnp.int32))
        offset += d
    x = jnp.concatenate(rows, axis=0)
    seg = jnp.concatenate(seg)
    Tt = x.shape[0]
    Tp = _round_up(Tt, 16)
    if Tp != Tt:
        # pad rows get unique segment ids -> they only attend to themselves (no NaNs)
        x = jnp.pad(x, ((0, Tp - Tt), (0, 0)))
        seg = jnp.concatenate([seg, B + jnp.arange(Tp - Tt, dtype=jnp.int32)])

    y = _transformer_and_head(params, x, seg)

    # ---- split per-sequence outputs, dropping the time row ----
    outputs = []
    offset = 0
    for i in range(B):
        outputs.append(y[offset:offset + durations[i]])
        offset += durations[i] + 1
    return outputs


# --------------------------- demo ---------------------------

if __name__ == "__main__":
    key = jax.random.PRNGKey(0)
    pkey, dkey = jax.random.split(key)
    params = init_params(pkey)

    B = 2
    durations = [12, 8]
    text_lens = [5, 8]
    dkeys = jax.random.split(dkey, 6)
    condition_text = [
        jax.random.randint(dkeys[i], (text_lens[i],), 0, N_VOCAB, dtype=jnp.int32)
        for i in range(B)
    ]
    condition_audio = [
        jax.random.normal(dkeys[2 + i], (durations[i], N_MELS), jnp.float32) for i in range(B)
    ]
    noisy_audio = [
        jax.random.normal(dkeys[4 + i], (durations[i], N_MELS), jnp.float32) for i in range(B)
    ]
    times = [0.25, 0.75]

    outputs = forward(params, condition_text, condition_audio, noisy_audio, times)
    outputs = [jax.block_until_ready(o) for o in outputs]

    assert outputs[0].shape == (durations[0], N_MELS)
    assert outputs[1].shape == (durations[1], N_MELS)
    assert all(bool(jnp.all(jnp.isfinite(o))) for o in outputs)
    print("KERNEL_OK")
</pallas_src>

<mosaic_0001>
module attributes {stable_mosaic.version = 11 : i64} {
  func.func @_fused_matmul_kernel(%arg0: i32, %arg1: i32, %arg2: memref<32x16xbf16, #tpu.memory_space<vmem>>, %arg3: memref<16x128xbf16, #tpu.memory_space<vmem>>, %arg4: memref<32x128xbf16, #tpu.memory_space<vmem>>, %arg5: memref<32x128xbf16, #tpu.memory_space<vmem>>) attributes {dimension_semantics = [#tpu.dimension_semantics<parallel>, #tpu.dimension_semantics<parallel>], iteration_bounds = array<i64: 1, 1>, scalar_prefetch = 0 : i64, scratch_operands = 0 : i64, tpu.core_type = #tpu.core_type<tc>, window_params = [{transform_indices = @transform_0, window_bounds = array<i64: 32, 16>}, {transform_indices = @transform_1, window_bounds = array<i64: 16, 128>}, {transform_indices = @transform_2, window_bounds = array<i64: 32, 128>}, {transform_indices = @transform_3, window_bounds = array<i64: 32, 128>}]} {
    %c0 = arith.constant 0 : index
    %c0_0 = arith.constant 0 : index
    %0 = vector.load %arg2[%c0, %c0_0] : memref<32x16xbf16, #tpu.memory_space<vmem>>, vector<32x16xbf16>
    %c0_1 = arith.constant 0 : index
    %c0_2 = arith.constant 0 : index
    %1 = vector.load %arg3[%c0_1, %c0_2] : memref<16x128xbf16, #tpu.memory_space<vmem>>, vector<16x128xbf16>
    %cst = arith.constant dense<0.000000e+00> : vector<32x128xf32>
    %2 = tpu.matmul %0, %1, %cst {dimension_numbers = #tpu.dot_dimension_numbers<[1], [0], [0], [1], [0, 0, 1, 1], [], []>} : vector<32x16xbf16>, vector<16x128xbf16>, vector<32x128xf32> -> vector<32x128xf32>
    %c0_3 = arith.constant 0 : index
    %c0_4 = arith.constant 0 : index
    %3 = vector.load %arg4[%c0_3, %c0_4] : memref<32x128xbf16, #tpu.memory_space<vmem>>, vector<32x128xbf16>
    %4 = arith.extf %3 : vector<32x128xbf16> to vector<32x128xf32>
    %5 = arith.addf %2, %4 : vector<32x128xf32>
    %6 = arith.truncf %5 : vector<32x128xf32> to vector<32x128xbf16>
    %c0_5 = arith.constant 0 : index
    %c0_6 = arith.constant 0 : index
    %7 = vector.load %arg5[%c0_5, %c0_6] : memref<32x128xbf16, #tpu.memory_space<vmem>>, vector<32x128xbf16>
    tpu.vector_store %arg5[%c0_5, %c0_6], %6 {strides = array<i32>} : memref<32x128xbf16, #tpu.memory_space<vmem>>, vector<32x128xbf16>,
    return
  }
  func.func @transform_0(%arg0: i32, %arg1: i32) -> (i32, i32) {
    %c0_i32 = arith.constant 0 : i32
    %c0_i32_0 = arith.constant 0 : i32
    return %arg0, %c0_i32 : i32, i32
  }
  func.func @transform_1(%arg0: i32, %arg1: i32) -> (i32, i32) {
    %c0_i32 = arith.constant 0 : i32
    %c0_i32_0 = arith.constant 0 : i32
    return %c0_i32, %arg1 : i32, i32
  }
  func.func @transform_2(%arg0: i32, %arg1: i32) -> (i32, i32) {
    %c0_i32 = arith.constant 0 : i32
    return %arg0, %arg1 : i32, i32
  }
  func.func @transform_3(%arg0: i32, %arg1: i32) -> (i32, i32) {
    %c0_i32 = arith.constant 0 : i32
    return %arg0, %arg1 : i32, i32
  }
}

module attributes {stable_mosaic.version = 11 : i64} {
  func.func @_fused_matmul_kernel(%arg0: i32, %arg1: i32, %arg2: memref<32x128xbf16, #tpu.memory_space<vmem>>, %arg3: memref<32x128xbf16, #tpu.memory_space<vmem>>, %arg4: memref<32x128xbf16, #tpu.memory_space<vmem>>, %arg5: memref<128x128xbf16, #tpu.memory_space<vmem>>, %arg6: memref<128x128xbf16, #tpu.memory_space<vmem>>, %arg7: memref<128x128xbf16, #tpu.memory_space<vmem>>, %arg8: memref<32x128xbf16, #tpu.memory_space<vmem>>) attributes {dimension_semantics = [#tpu.dimension_semantics<parallel>, #tpu.dimension_semantics<parallel>], iteration_bounds = array<i64: 1, 1>, scalar_prefetch = 0 : i64, scratch_operands = 0 : i64, tpu.core_type = #tpu.core_type<tc>, window_params = [{transform_indices = @transform_0, window_bounds = array<i64: 32, 128>}, {transform_indices = @transform_1, window_bounds = array<i64: 32, 128>}, {transform_indices = @transform_2, window_bounds = array<i64: 32, 128>}, {transform_indices = @transform_3, window_bounds = array<i64: 128, 128>}, {transform_indices = @transform_4, window_bounds = array<i64: 128, 128>}, {transform_indices = @transform_5, window_bounds = array<i64: 128, 128>}, {transform_indices = @transform_6, window_bounds = array<i64: 32, 128>}]} {
    %c0 = arith.constant 0 : index
    %c0_0 = arith.constant 0 : index
    %0 = vector.load %arg2[%c0, %c0_0] : memref<32x128xbf16, #tpu.memory_space<vmem>>, vector<32x128xbf16>
    %c0_1 = arith.constant 0 : index
    %c0_2 = arith.constant 0 : index
    %1 = vector.load %arg5[%c0_1, %c0_2] : memref<128x128xbf16, #tpu.memory_space<vmem>>, vector<128x128xbf16>
    %cst = arith.constant dense<0.000000e+00> : vector<32x128xf32>
    %2 = tpu.matmul %0, %1, %cst {dimension_numbers = #tpu.dot_dimension_numbers<[1], [0], [0], [1], [0, 0, 1, 1], [], []>} : vector<32x128xbf16>, vector<128x128xbf16>, vector<32x128xf32> -> vector<32x128xf32>
    %c0_3 = arith.constant 0 : index
    %c0_4 = arith.constant 0 : index
    %3 = vector.load %arg3[%c0_3, %c0_4] : memref<32x128xbf16, #tpu.memory_space<vmem>>, vector<32x128xbf16>
    %c0_5 = arith.constant 0 : index
    %c0_6 = arith.constant 0 : index
    %4 = vector.load %arg6[%c0_5, %c0_6] : memref<128x128xbf16, #tpu.memory_space<vmem>>, vector<128x128xbf16>
    %cst_7 = arith.constant dense<0.000000e+00> : vector<32x128xf32>
    %5 = tpu.matmul %3, %4, %cst_7 {dimension_numbers = #tpu.dot_dimension_numbers<[1], [0], [0], [1], [0, 0, 1, 1], [], []>} : vector<32x128xbf16>, vector<128x128xbf16>, vector<32x128xf32> -> vector<32x128xf32>
    %6 = arith.addf %2, %5 : vector<32x128xf32>
    %c0_8 = arith.constant 0 : index
    %c0_9 = arith.constant 0 : index
    %7 = vector.load %arg4[%c0_8, %c0_9] : memref<32x128xbf16, #tpu.memory_space<vmem>>, vector<32x128xbf16>
    %c0_10 = arith.constant 0 : index
    %c0_11 = arith.constant 0 : index
    %8 = vector.load %arg7[%c0_10, %c0_11] : memref<128x128xbf16, #tpu.memory_space<vmem>>, vector<128x128xbf16>
    %cst_12 = arith.constant dense<0.000000e+00> : vector<32x128xf32>
    %9 = tpu.matmul %7, %8, %cst_12 {dimension_numbers = #tpu.dot_dimension_numbers<[1], [0], [0], [1], [0, 0, 1, 1], [], []>} : vector<32x128xbf16>, vector<128x128xbf16>, vector<32x128xf32> -> vector<32x128xf32>
    %10 = arith.addf %6, %9 : vector<32x128xf32>
    %11 = arith.truncf %10 : vector<32x128xf32> to vector<32x128xbf16>
    %c0_13 = arith.constant 0 : index
    %c0_14 = arith.constant 0 : index
    %12 = vector.load %arg8[%c0_13, %c0_14] : memref<32x128xbf16, #tpu.memory_space<vmem>>, vector<32x128xbf16>
    tpu.vector_store %arg8[%c0_13, %c0_14], %11 {strides = array<i32>} : memref<32x128xbf16, #tpu.memory_space<vmem>>, vector<32x128xbf16>,
    return
  }
  func.func @transform_0(%arg0: i32, %arg1: i32) -> (i32, i32) {
    %c0_i32 = arith.constant 0 : i32
    %c0_i32_0 = arith.constant 0 : i32
    return %arg0, %c0_i32 : i32, i32
  }
  func.func @transform_1(%arg0: i32, %arg1: i32) -> (i32, i32) {
    %c0_i32 = arith.constant 0 : i32
    %c0_i32_0 = arith.constant 0 : i32
    return %arg0, %c0_i32 : i32, i32
  }
  func.func @transform_2(%arg0: i32, %arg1: i32) -> (i32, i32) {
    %c0_i32 = arith.constant 0 : i32
    %c0_i32_0 = arith.constant 0 : i32
    return %arg0, %c0_i32 : i32, i32
  }
  func.func @transform_3(%arg0: i32, %arg1: i32) -> (i32, i32) {
    %c0_i32 = arith.constant 0 : i32
    %c0_i32_0 = arith.constant 0 : i32
    return %c0_i32, %arg1 : i32, i32
  }
  func.func @transform_4(%arg0: i32, %arg1: i32) -> (i32, i32) {
    %c0_i32 = arith.constant 0 : i32
    %c0_i32_0 = arith.constant 0 : i32
    return %c0_i32, %arg1 : i32, i32
  }
  func.func @transform_5(%arg0: i32, %arg1: i32) -> (i32, i32) {
    %c0_i32 = arith.constant 0 : i32
    %c0_i32_0 = arith.constant 0 : i32
    return %c0_i32, %arg1 : i32, i32
  }
  func.func @transform_6(%arg0: i32, %arg1: i32) -> (i32, i32) {
    %c0_i32 = arith.constant 0 : i32
    return %arg0, %arg1 : i32, i32
  }
}

</mosaic_0001>

<bundles_post_ra>
// kernel: _embed_and_project.3
= control target key start
LH: loop header
LB: loop body
LE: loop exit
PB: predicated region body
PF: predicated region fallthrough
CT: control target
= control target key end

     0   :  { %vm45_vm0 = vcmask 130048   ;;  %s162_s1 = inlined_call_operand.vmem [shape: bf16[16,128], index: 1, kind: input, shape index: {}]   ;;  %s163_s0 = inlined_call_operand.vmem [shape: bf16[32,16], index: 0, kind: input, shape index: {}]   ;;  %s164_s2 = inlined_call_operand.vmem [shape: bf16[32,128], index: 2, kind: input, shape index: {}]   ;;  %s165_s3 = inlined_call_operand.vmem [shape: bf16[32,128], index: 3, kind: output, shape index: {}]  }
   0x1   :  { %v99_v0 = vld [vmem:[%s162_s1] sm:$0xff]  ;;  %v98_v2 = vld [vmem:[%s163_s0 + $0x8] sm:$0xff] }
   0x2   :  { %v97_v1 = vld [vmem:[%s163_s0] sm:$0xff]  ;;  %59 = vmatpush.bf16.msra.mxu0 %v99_v0  ;;  %120 = vmatpush.bf16.msra.mxu1 %v99_v0  ;;  %v118_v6 = vld [vmem:[%s164_s2 + $0x8] sm:$0xff]  }
   0x3   :  { %v101_v5 = vld [vmem:[%s164_s2] sm:$0xff]   ;;  %v106_v8 = vunpack.c.l.bf16 %v118_v6  ;;  %v107_v10 = vunpack.c.h.bf16 %v118_v6 }
   0x4   :  { %v102_v7 = vunpack.c.l.bf16 %v101_v5  ;;  %v103_v9 = vunpack.c.h.bf16 %v101_v5 }
   0x5   :  { %95 = vmatmul.msk.bf16.vlgmr.msra.gmra.mxu0 %vm45_vm0, %v97_v1  ;;  %96 = vmatmul.msk.bf16.vlgmr.msra.gmra.mxu1 %vm45_vm0, %v98_v2 }
  0x82   :  { %v61_v3 = vpop.f32.mrf.mxu0  ;;  %v66_v4 = vpop.f32.mrf.mxu1 }
  0x83   :  { %v62_v13 = vadd.f32 %v102_v7, %v61_v3  ;;  %v67_v14 = vadd.f32 %v106_v8, %v66_v4 }
  0x8a   :  { %v63_v11 = vpop.f32.mrf.mxu0  ;;  %v68_v12 = vpop.f32.mrf.mxu1 }
  0x8b   :  { %v64_v15 = vadd.f32 %v103_v9, %v63_v11  ;;  %v69_v16 = vadd.f32 %v107_v10, %v68_v12 }
  0x8d   :  { %v111_v17 = vpack.c.bf16 %v64_v15, %v62_v13  ;;  %v116_v18 = vpack.c.bf16 %v69_v16, %v67_v14 }
  0x8f   :  { %112 = vst [vmem:[%s165_s3] sm:$0xff] %v111_v17  }
  0x90   :  { %119 = vst [vmem:[%s165_s3 + $0x8] sm:$0xff] %v116_v18  }

// kernel: _embed_and_project.5
= control target key start
LH: loop header
LB: loop body
LE: loop exit
PB: predicated region body
PF: predicated region fallthrough
CT: control target
= control target key end

     0   :  { %s636_s4 = inlined_call_operand.vmem [shape: bf16[128,128], index: 4, kind: input, shape index: {}]   ;;  %s637_s3 = inlined_call_operand.vmem [shape: bf16[128,128], index: 3, kind: input, shape index: {}]   ;;  %s638_s5 = inlined_call_operand.vmem [shape: bf16[128,128], index: 5, kind: input, shape index: {}]   ;;  %s639_s1 = inlined_call_operand.vmem [shape: bf16[32,128], index: 1, kind: input, shape index: {}]   ;;  %s640_s0 = inlined_call_operand.vmem [shape: bf16[32,128], index: 0, kind: input, shape index: {}]   ;;  %s641_s2 = inlined_call_operand.vmem [shape: bf16[32,128], index: 2, kind: input, shape index: {}]   ;;  %s642_s6 = inlined_call_operand.vmem [shape: bf16[32,128], index: 6, kind: output, shape index: {}]  }
   0x1   :  { %v475_v0 = vld [vmem:[%s636_s4 + $0x38] sm:$0xff]  ;;  %v474_v3 = vld [vmem:[%s636_s4 + $0x30] sm:$0xff]  ;;  %v473_v6 = vld [vmem:[%s636_s4 + $0x28] sm:$0xff] }
   0x2   :  { %v465_v1 = vld [vmem:[%s637_s3 + $0x38] sm:$0xff]  ;;  %123 = vmatpush.bf16.msra.mxu0 %v475_v0  ;;  %v464_v4 = vld [vmem:[%s637_s3 + $0x30] sm:$0xff]  ;;  %497 = vmatpush.bf16.msra.mxu3 %v475_v0  ;;  %v463_v7 = vld [vmem:[%s637_s3 + $0x28] sm:$0xff] }
   0x3   :  { %v485_v2 = vld [vmem:[%s638_s5 + $0x38] sm:$0xff]  ;;  %202 = vmatpush.bf16.msra.mxu1 %v465_v1  ;;  %v484_v5 = vld [vmem:[%s638_s5 + $0x30] sm:$0xff]  ;;  %v483_v8 = vld [vmem:[%s638_s5 + $0x28] sm:$0xff] }
   0x4   :  { %301 = vmatpush.bf16.msra.mxu2 %v485_v2  ;;  %v472_v9 = vld [vmem:[%s636_s4 + $0x20] sm:$0xff]  ;;  %v471_v12 = vld [vmem:[%s636_s4 + $0x18] sm:$0xff]  ;;  %v470_v15 = vld [vmem:[%s636_s4 + $0x10] sm:$0xff] }
   0x5   :  { %v462_v10 = vld [vmem:[%s637_s3 + $0x20] sm:$0xff]  ;;  %v461_v13 = vld [vmem:[%s637_s3 + $0x18] sm:$0xff]  ;;  %v460_v16 = vld [vmem:[%s637_s3 + $0x10] sm:$0xff] }
   0x6   :  { %124 = vmatpush.bf16.msra.mxu0 %v474_v3  ;;  %498 = vmatpush.bf16.msra.mxu3 %v474_v3  ;;  %v482_v11 = vld [vmem:[%s638_s5 + $0x20] sm:$0xff]  ;;  %v481_v14 = vld [vmem:[%s638_s5 + $0x18] sm:$0xff]  ;;  %v480_v17 = vld [vmem:[%s638_s5 + $0x10] sm:$0xff] }
   0x7   :  { %203 = vmatpush.bf16.msra.mxu1 %v464_v4  ;;  %v469_v18 = vld [vmem:[%s636_s4 + $0x8] sm:$0xff]  ;;  %v468_v21 = vld [vmem:[%s636_s4] sm:$0xff] }
   0x8   :  { %302 = vmatpush.bf16.msra.mxu2 %v484_v5  ;;  %v459_v19 = vld [vmem:[%s637_s3 + $0x8] sm:$0xff]  ;;  %v458_v22 = vld [vmem:[%s637_s3] sm:$0xff] }
   0x9   :  { %v479_v20 = vld [vmem:[%s638_s5 + $0x8] sm:$0xff]  ;;  %v478_v23 = vld [vmem:[%s638_s5] sm:$0xff] }
   0xa   :  { %125 = vmatpush.bf16.msra.mxu0 %v473_v6  ;;  %499 = vmatpush.bf16.msra.mxu3 %v473_v6  ;;  %v466_v24 = vld [vmem:[%s639_s1] sm:$0xff]  ;;  %v467_v27 = vld [vmem:[%s639_s1 + $0x8] sm:$0xff] }
   0xb   :  { %204 = vmatpush.bf16.msra.mxu1 %v463_v7  ;;  %v456_v25 = vld [vmem:[%s640_s0] sm:$0xff]  ;;  %v457_v28 = vld [vmem:[%s640_s0 + $0x8] sm:$0xff] }
   0xc   :  { %303 = vmatpush.bf16.msra.mxu2 %v483_v8  ;;  %v476_v26 = vld [vmem:[%s641_s2] sm:$0xff]  ;;  %v477_v29 = vld [vmem:[%s641_s2 + $0x8] sm:$0xff] }
   0xe   :  { %126 = vmatpush.bf16.msra.mxu0 %v472_v9  ;;  %500 = vmatpush.bf16.msra.mxu3 %v472_v9 }
   0xf   :  { %205 = vmatpush.bf16.msra.mxu1 %v462_v10 }
  0x10   :  { %304 = vmatpush.bf16.msra.mxu2 %v482_v11 }
  0x12   :  { %127 = vmatpush.bf16.msra.mxu0 %v471_v12  ;;  %501 = vmatpush.bf16.msra.mxu3 %v471_v12 }
  0x13   :  { %206 = vmatpush.bf16.msra.mxu1 %v461_v13 }
  0x14   :  { %305 = vmatpush.bf16.msra.mxu2 %v481_v14 }
  0x16   :  { %128 = vmatpush.bf16.msra.mxu0 %v470_v15  ;;  %502 = vmatpush.bf16.msra.mxu3 %v470_v15 }
  0x17   :  { %207 = vmatpush.bf16.msra.mxu1 %v460_v16 }
  0x18   :  { %306 = vmatpush.bf16.msra.mxu2 %v480_v17 }
  0x1a   :  { %129 = vmatpush.bf16.msra.mxu0 %v469_v18  ;;  %503 = vmatpush.bf16.msra.mxu3 %v469_v18 }
  0x1b   :  { %208 = vmatpush.bf16.msra.mxu1 %v459_v19 }
  0x1c   :  { %307 = vmatpush.bf16.msra.mxu2 %v479_v20 }
  0x1e   :  { %130 = vmatpush.bf16.msra.mxu0 %v468_v21  ;;  %504 = vmatpush.bf16.msra.mxu3 %v468_v21 }
  0x1f   :  { %209 = vmatpush.bf16.msra.mxu1 %v458_v22 }
  0x20   :  { %308 = vmatpush.bf16.msra.mxu2 %v478_v23 }
  0x21   :  { %131 = vmatmul.bf16.vlgmr.msra.gmra.mxu0 %v466_v24  ;;  %136 = vmatmul.bf16.vlgmr.msra.gmra.mxu3 %v467_v27 }
  0x22   :  { %210 = vmatmul.bf16.vlgmr.msra.gmra.mxu1 %v456_v25 }
  0x23   :  { %309 = vmatmul.bf16.vlgmr.msra.gmra.mxu2 %v476_v26 }
  0x32   :  { %215 = vmatmul.bf16.gmra.mxu1 %v457_v28 }
  0x33   :  { %314 = vmatmul.bf16.gmra.mxu2 %v477_v29 }
  0x9e   :  { %v132_v31 = vpop.f32.mrf.mxu0 }
  0x9f   :  { %v211_v30 = vpop.f32.mrf.mxu1 }
  0xa0   :  { %v212_v35 = vadd.f32 %v211_v30, %v132_v31 }
  0xa4   :  { %v137_v42 = vpop.f32.mrf.mxu3 }
  0xa6   :  { %v310_v32 = vpop.f32.mrf.mxu2  ;;  %v134_v34 = vpop.f32.mrf.mxu0 }
  0xa7   :  { %v213_v33 = vpop.f32.mrf.mxu1  ;;  %v320_v38 = vadd.f32 %v310_v32, %v212_v35 }
  0xa8   :  { %v214_v36 = vadd.f32 %v213_v33, %v134_v34 }
  0xac   :  { %v139_v46 = vpop.f32.mrf.mxu3 }
  0xae   :  { %v312_v37 = vpop.f32.mrf.mxu2 }
  0xaf   :  { %v321_v39 = vadd.f32 %v312_v37, %v214_v36  ;;  %v216_v40 = vpop.f32.mrf.mxu1 }
  0xb0   :  { %v217_v45 = vadd.f32 %v216_v40, %v137_v42 }
  0xb1   :  { %v489_v41 = vpack.c.bf16 %v321_v39, %v320_v38 }
  0xb3   :  { %490 = vst [vmem:[%s642_s6] sm:$0xff] %v489_v41  }
  0xb6   :  { %v315_v43 = vpop.f32.mrf.mxu2 }
  0xb7   :  { %v218_v44 = vpop.f32.mrf.mxu1  ;;  %v322_v49 = vadd.f32 %v315_v43, %v217_v45 }
  0xb8   :  { %v219_v47 = vadd.f32 %v218_v44, %v139_v46 }
  0xbe   :  { %v317_v48 = vpop.f32.mrf.mxu2 }
  0xbf   :  { %v323_v50 = vadd.f32 %v317_v48, %v219_v47 }
  0xc1   :  { %v494_v51 = vpack.c.bf16 %v323_v50, %v322_v49 }
  0xc3   :  { %496 = vst [vmem:[%s642_s6 + $0x8] sm:$0xff] %v494_v51  }

</bundles_post_ra>
